<compile_context>
chip_gen: v7x
topology: tpu7x:2x2x1
jax: 0.10.0
libtpu: 0.0.40
codegen_flags: <defaults>
</compile_context>

<pallas_src>
import functools
import math

import numpy as np
import jax
import jax.numpy as jnp
from jax.experimental import pallas as pl
from jax.experimental.pallas import tpu as pltpu

FREQ_DIM = 256   # frequency_embedding_size (even)
SCALE = 1.0      # TimeEmbedding scale (folded into the frequency table)


def timestep_embedder_kernel(t_ref, freqs_ref, w_ref, b_ref, out_ref,
                             *, freq_dim):
    # args: (N, half) f32 — scale already folded into freqs on the host.
    args = t_ref[...] * freqs_ref[...]

    # cat([cos, sin], -1): the concat boundary is at half = 128 lanes, so this
    # is pure vreg placement; cast once to bf16 for the MXU.
    emb = jnp.concatenate([jnp.cos(args), jnp.sin(args)],
                          axis=-1).astype(jnp.bfloat16)

    # Layer 1: single K=256 matmul (one MXU weight pass on v6e/v7x).
    w1 = w_ref[:freq_dim, :]          # (freq_dim, hp) bf16, static slice
    h = (jnp.dot(emb, w1, preferred_element_type=jnp.float32)
         + b_ref[0:1, :])

    # SiLU in f32 (v5e VPU/EUP have no bf16; one vreg-row of work here).
    h = h * jax.nn.sigmoid(h)

    # Layer 2: Linear(HIDDEN -> HIDDEN), bf16 inputs, f32 acc, lane-dense store.
    w2 = w_ref[freq_dim:, :]          # (hp, hp) bf16, static slice
    out_ref[...] = (
        jnp.dot(h.astype(jnp.bfloat16), w2,
                preferred_element_type=jnp.float32)
        + b_ref[1:2, :]
    )


def prepare_timestep_embedder_params(w1, b1, w2, b2, *, scale=SCALE,
                                     freq_dim=FREQ_DIM):
    """One-time host-side prep (call at model init, NOT per forward).

    w1: (freq_dim, H), b1: (H,), w2: (H, H), b2: (H,)  (in-dim x out-dim,
    i.e. PyTorch Linear.weight.T).  Returns packed, padded, bf16 params.
    """
    hidden = w2.shape[1]
    half = freq_dim // 2
    hp = ((hidden + 127) // 128) * 128        # lane-dense hidden width

    # Frequency table with scale folded in (host-side numpy constant).
    freqs_np = np.exp(-math.log(10000.0)
                      * np.arange(half, dtype=np.float32) / half) * scale
    freqs = jnp.asarray(freqs_np, dtype=jnp.float32).reshape(1, half)

    def pad2(x, rows, cols):
        return jnp.pad(x, ((0, rows - x.shape[0]), (0, cols - x.shape[1])))

    # One bf16 weight slab: rows [0, freq_dim) = W1, rows [freq_dim, +hp) = W2.
    w1p = pad2(w1, freq_dim, hp)
    w2p = pad2(w2, hp, hp)
    w_slab = jnp.concatenate([w1p, w2p], axis=0).astype(jnp.bfloat16)

    # One f32 bias slab: row 0 = b1, row 1 = b2.
    b_slab = jnp.concatenate(
        [pad2(b1.reshape(1, hidden).astype(jnp.float32), 1, hp),
         pad2(b2.reshape(1, hidden).astype(jnp.float32), 1, hp)], axis=0)

    return dict(freqs=freqs, w_slab=w_slab, b_slab=b_slab,
                hidden=hidden, hp=hp, freq_dim=freq_dim, half=half)


def timestep_embedder(t, params, *, return_padded=False):
    """t: (N,) int/float timesteps. `params` from prepare_timestep_embedder_params.

    Returns (N, hidden) float32 embeddings (matches the PyTorch module), or the
    lane-dense (n_pad, hp) slab if return_padded=True (preferred when the
    consumer — e.g. an adaLN matmul — can take the padded layout directly)."""
    n = t.shape[0]
    hp = params["hp"]
    hidden = params["hidden"]
    freq_dim = params["freq_dim"]
    half = params["half"]

    # Sublane-aligned batch (16 = bf16 sublane tile; also covers f32's 8).
    n_pad = ((n + 15) // 16) * 16
    t2 = jnp.pad(t.astype(jnp.float32)[:, None], ((0, n_pad - n), (0, 0)))

    # Advisory cost hint so XLA can overlap this small custom call.
    flops = 2 * n_pad * (freq_dim * hp + hp * hp)
    transcendentals = n_pad * (freq_dim + hp)
    bytes_accessed = ((freq_dim + hp) * hp * 2    # weight slab (bf16)
                      + 2 * hp * 4                # bias slab (f32)
                      + half * 4                  # freqs
                      + n_pad * (1 + hp) * 4)     # t in, out

    vmem = pl.BlockSpec(memory_space=pltpu.MemorySpace.VMEM)
    out = pl.pallas_call(
        functools.partial(timestep_embedder_kernel, freq_dim=freq_dim),
        out_shape=jax.ShapeDtypeStruct((n_pad, hp), jnp.float32),
        in_specs=[vmem] * 4,
        out_specs=vmem,
        cost_estimate=pl.CostEstimate(flops=flops,
                                      transcendentals=transcendentals,
                                      bytes_accessed=bytes_accessed),
    )(t2, params["freqs"], params["w_slab"], params["b_slab"])

    if return_padded:
        return out
    return out[:n, :hidden]


def timestep_embedder_ref_f32(t, w1, b1, w2, b2, scale=SCALE):
    """Pure-f32 JAX reference mirroring the PyTorch forward."""
    half = FREQ_DIM // 2
    freqs = jnp.exp(-math.log(10000.0)
                    * jnp.arange(half, dtype=jnp.float32) / half)
    args = t.astype(jnp.float32)[:, None] * freqs[None] * scale
    emb = jnp.concatenate([jnp.cos(args), jnp.sin(args)], axis=-1)
    h = emb @ w1 + b1
    h = h * jax.nn.sigmoid(h)
    return h @ w2 + b2


def timestep_embedder_ref_bf16(t, w1, b1, w2, b2, scale=SCALE):
    """Reference mirroring the kernel's bf16-weight / f32-accumulate math."""
    half = FREQ_DIM // 2
    freqs = jnp.exp(-math.log(10000.0)
                    * jnp.arange(half, dtype=jnp.float32) / half) * scale
    args = t.astype(jnp.float32)[:, None] * freqs[None]
    emb = jnp.concatenate([jnp.cos(args), jnp.sin(args)],
                          axis=-1).astype(jnp.bfloat16)
    h = (jnp.dot(emb, w1.astype(jnp.bfloat16),
                 preferred_element_type=jnp.float32) + b1)
    h = h * jax.nn.sigmoid(h)
    return (jnp.dot(h.astype(jnp.bfloat16), w2.astype(jnp.bfloat16),
                    preferred_element_type=jnp.float32) + b2)


if __name__ == "__main__":
    N = 8          # batch of timesteps
    HIDDEN = 32    # hidden_size

    key = jax.random.PRNGKey(0)
    k_t, k_w1, k_b1, k_w2, k_b2 = jax.random.split(key, 5)

    # Deterministic synthetic parameters (shapes from the module's __init__),
    # stored as in-dim x out-dim (i.e. PyTorch Linear.weight.T).
    w1 = jax.random.normal(k_w1, (FREQ_DIM, HIDDEN), jnp.float32) * 0.02
    b1 = jax.random.normal(k_b1, (HIDDEN,), jnp.float32) * 0.02
    w2 = jax.random.normal(k_w2, (HIDDEN, HIDDEN), jnp.float32) * 0.02
    b2 = jax.random.normal(k_b2, (HIDDEN,), jnp.float32) * 0.02

    # Integer timesteps in [0, 1000)
    t = jax.random.randint(k_t, (N,), 0, 1000, dtype=jnp.int32)

    # One-time param prep (done at model init in real use).
    params = prepare_timestep_embedder_params(w1, b1, w2, b2)
    params = jax.tree_util.tree_map(
        lambda x: jax.block_until_ready(x) if isinstance(x, jax.Array) else x,
        params)

    out = timestep_embedder(t, params)
    out = jax.block_until_ready(out)

    assert out.shape == (N, HIDDEN) and out.dtype == jnp.float32

    # Tight check against a reference that mirrors the kernel's bf16 math.
    ref_bf16 = timestep_embedder_ref_bf16(t, w1, b1, w2, b2)
    assert jnp.allclose(out, ref_bf16, atol=1e-4, rtol=1e-3), \
        "mismatch vs bf16-matched reference"

    # Looser check against the pure-f32 PyTorch-equivalent forward
    # (difference is only the bf16 weight/input quantization).
    ref_f32 = timestep_embedder_ref_f32(t, w1, b1, w2, b2)
    assert jnp.allclose(out, ref_f32, atol=5e-3, rtol=5e-2), \
        "mismatch vs f32 reference"

    print("KERNEL_OK")
</pallas_src>

<mosaic_0001>
module attributes {stable_mosaic.version = 11 : i64} {
  func.func @timestep_embedder_kernel(%arg0: memref<16x1xf32, #tpu.memory_space<vmem>>, %arg1: memref<1x128xf32, #tpu.memory_space<vmem>>, %arg2: memref<384x128xbf16, #tpu.memory_space<vmem>>, %arg3: memref<2x128xf32, #tpu.memory_space<vmem>>, %arg4: memref<16x128xf32, #tpu.memory_space<vmem>>) attributes {dimension_semantics = [], scalar_prefetch = 0 : i64, scratch_operands = 0 : i64, tpu.core_type = #tpu.core_type<tc>} {
    %c0 = arith.constant 0 : index
    %c0_0 = arith.constant 0 : index
    %0 = vector.load %arg0[%c0, %c0_0] : memref<16x1xf32, #tpu.memory_space<vmem>>, vector<16x1xf32>
    %c0_1 = arith.constant 0 : index
    %c0_2 = arith.constant 0 : index
    %1 = vector.load %arg1[%c0_1, %c0_2] : memref<1x128xf32, #tpu.memory_space<vmem>>, vector<1x128xf32>
    %2 = vector.broadcast %0 : vector<16x1xf32> to vector<16x128xf32>
    %3 = vector.broadcast %1 : vector<1x128xf32> to vector<16x128xf32>
    %4 = arith.mulf %2, %3 : vector<16x128xf32>
    %5 = math.cos %4 : vector<16x128xf32>
    %6 = math.sin %4 : vector<16x128xf32>
    %7 = tpu.concatenate %5, %6 in 1 : vector<16x128xf32>, vector<16x128xf32> -> vector<16x256xf32>
    %8 = arith.truncf %7 : vector<16x256xf32> to vector<16x256xbf16>
    %c0_3 = arith.constant 0 : index
    %c0_4 = arith.constant 0 : index
    %9 = vector.load %arg2[%c0_3, %c0_4] : memref<384x128xbf16, #tpu.memory_space<vmem>>, vector<256x128xbf16>
    %cst = arith.constant dense<0.000000e+00> : vector<16x128xf32>
    %10 = tpu.matmul %8, %9, %cst {dimension_numbers = #tpu.dot_dimension_numbers<[1], [0], [0], [1], [0, 0, 1, 1], [], []>} : vector<16x256xbf16>, vector<256x128xbf16>, vector<16x128xf32> -> vector<16x128xf32>
    %c0_5 = arith.constant 0 : index
    %c0_6 = arith.constant 0 : index
    %11 = vector.load %arg3[%c0_5, %c0_6] : memref<2x128xf32, #tpu.memory_space<vmem>>, vector<1x128xf32>
    %12 = vector.broadcast %11 : vector<1x128xf32> to vector<16x128xf32>
    %13 = arith.addf %10, %12 : vector<16x128xf32>
    %14 = arith.negf %13 : vector<16x128xf32>
    %15 = math.exp %14 : vector<16x128xf32>
    %cst_7 = arith.constant 1.000000e+00 : f32
    %16 = vector.broadcast %cst_7 : f32 to vector<16x128xf32>
    %17 = arith.addf %16, %15 : vector<16x128xf32>
    %18 = arith.divf %16, %17 : vector<16x128xf32>
    %19 = arith.mulf %13, %18 : vector<16x128xf32>
    %c256 = arith.constant 256 : index
    %c0_8 = arith.constant 0 : index
    %20 = vector.load %arg2[%c256, %c0_8] : memref<384x128xbf16, #tpu.memory_space<vmem>>, vector<128x128xbf16>
    %21 = arith.truncf %19 : vector<16x128xf32> to vector<16x128xbf16>
    %cst_9 = arith.constant dense<0.000000e+00> : vector<16x128xf32>
    %22 = tpu.matmul %21, %20, %cst_9 {dimension_numbers = #tpu.dot_dimension_numbers<[1], [0], [0], [1], [0, 0, 1, 1], [], []>} : vector<16x128xbf16>, vector<128x128xbf16>, vector<16x128xf32> -> vector<16x128xf32>
    %c1 = arith.constant 1 : index
    %c0_10 = arith.constant 0 : index
    %23 = vector.load %arg3[%c1, %c0_10] : memref<2x128xf32, #tpu.memory_space<vmem>>, vector<1x128xf32>
    %24 = vector.broadcast %23 : vector<1x128xf32> to vector<16x128xf32>
    %25 = arith.addf %22, %24 : vector<16x128xf32>
    %c0_11 = arith.constant 0 : index
    %c0_12 = arith.constant 0 : index
    %26 = vector.load %arg4[%c0_11, %c0_12] : memref<16x128xf32, #tpu.memory_space<vmem>>, vector<16x128xf32>
    tpu.vector_store %arg4[%c0_11, %c0_12], %25 {strides = array<i32>} : memref<16x128xf32, #tpu.memory_space<vmem>>, vector<16x128xf32>,
    return
  }
}

</mosaic_0001>

<bundles_post_ra>
// kernel: tpu_custom_call.1
= control target key start
LH: loop header
LB: loop body
LE: loop exit
PB: predicated region body
PF: predicated region fallthrough
CT: control target
= control target key end

     0   :  { %9 = vsyncpa [#allocation3], 0  ;;  %s1144_s0 = inlined_call_operand.vmem [shape: f32[16,1], index: 0, kind: input, shape index: {}]   ;;  %s1145_s1 = inlined_call_operand.vmem [shape: f32[1,128], index: 1, kind: input, shape index: {}]   ;;  %s1146_s2 = inlined_call_operand.hbm [shape: bf16[384,128], index: 2, kind: input, shape index: {}]   ;;  %s1147_s3 = inlined_call_operand.vmem [shape: f32[2,128], index: 3, kind: input, shape index: {}]   ;;  %s1148_s4 = inlined_call_operand.hbm [shape: f32[16,128], index: 4, kind: output, shape index: {}]  }
   0x1   :  { %10 = vsyncpa [#allocation4], 0  ;;  %s996_s15 = smov [#allocation2]   ;;  %s948_s19 = scalar_lea.hbm %s1146_s2, 3072 }
   0x2   :  { %s20_s16 = sshll.u32 %s996_s15, 4  ;;  %p949_p0 = scmp.ne.s32.totalorder %s1146_s2, %s948_s19  ;;  %s21_s16 = int_to_ptr.vmem [resolvable:$true] %s20_s16 }
   0x3   :  { %p952_p1 = scmp.lt.u32.totalorder %s948_s19, %s1146_s2 }
   0x5   :  { %p954_p2 = pnand %p952_p1, %p949_p0 }
   0x7   :  { %957 = shalt.err (!%p954_p2)
}
   0x8   :  { %s958_s24 = scalar_lea.vmem %s21_s16, 3072  ;;  %p963_p4 = scmp.lt.s32.totalorder %s21_s16, %s21_s16 }
   0x9   :  { %p959_p3 = scmp.ne.s32.totalorder %s21_s16, %s958_s24  ;;  %p964_p5 = scmp.lt.s32.totalorder %s958_s24, %s958_s24 }
   0xb   :  { %p965_p6 = por %p964_p5, %p963_p4 }
   0xd   :  { %p966_p7 = pnand %p965_p6, %p959_p3 }
   0xf   :  { %969 = shalt.err (!%p966_p7)
}
  0x10   :  { %s997_s25 = smov 64   ;;  %s998_s26 = smov 4  }
  0x11   :  { %26 = dma.hbm_to_vmem [thread:$0]  %s1146_s2, 3072, %s21_s16, [#allocation3], %s997_s25, %s997_s25, %s998_s26  }
  0x12   :  { %992 = dma.done.wait [#allocation3], 3072  }
  0x13   :  { %993 = vsyncadd [#allocation3], 4294964224  ;;  %v999_v0 = vmov 0   ;;  %v33_v1 = vld [vmem:[%s1144_s0] sm:$0xff]  ;;  %v34_v2 = vld [vmem:[%s1144_s0 + $0x8] sm:$0xff]  ;;  %s1008_s10 = smov [#allocation5]  }
  0x14   :  { %907 = vset.pattern.permute.xlu0 %v999_v0  ;;  %v908_v3 = vld [vmem:[#allocation2 + $0x40] sm:$0xff]   ;;  %v910_v5 = vld [vmem:[#allocation2 + $0x48] sm:$0xff]   ;;  %v912_v7 = vld [vmem:[#allocation2 + $0x50] sm:$0xff]   ;;  %v1000_v40 = vmov 683565275   ;;  %s776_s11 = sshll.u32 %s1008_s10, 4  ;;  %s777_s11 = int_to_ptr.vmem [resolvable:$true] %s776_s11 }
  0x15   :  { %38 = vperm.xlu0 %907, %v33_v1   ;;  %v909_v4 = vld [vmem:[#allocation2] sm:$0xff]   ;;  %833 = vmatprep.subr.bf16.mxu0 %v908_v3  ;;  %v911_v6 = vld [vmem:[#allocation2 + $0x8] sm:$0xff]   ;;  %v913_v8 = vld [vmem:[#allocation2 + $0x10] sm:$0xff]   ;;  %v1001_v44 = vmov 2475754826   ;;  %s970_s12 = scalar_lea.vmem %s777_s11, 256  ;;  %p975_p9 = scmp.lt.s32.totalorder %s777_s11, %s777_s11 }
  0x16   :  { %834 = vmatpush3.bf16.msra.mxu0 %v909_v4  ;;  %v914_v9 = vld [vmem:[#allocation2 + $0x58] sm:$0xff]   ;;  %v916_v11 = vld [vmem:[#allocation2 + $0x60] sm:$0xff]   ;;  %v918_v13 = vld [vmem:[#allocation2 + $0x68] sm:$0xff]   ;;  %v1002_v46 = vmov 2131351028   ;;  %p971_p8 = scmp.ne.s32.totalorder %s777_s11, %s970_s12  ;;  %p976_p10 = scmp.lt.s32.totalorder %s970_s12, %s970_s12 }
  0x17   :  { %835 = vmatprep.subr.bf16.mxu0 %v910_v5  ;;  %v915_v10 = vld [vmem:[#allocation2 + $0x18] sm:$0xff]   ;;  %v917_v12 = vld [vmem:[#allocation2 + $0x20] sm:$0xff]   ;;  %v919_v14 = vld [vmem:[#allocation2 + $0x28] sm:$0xff]   ;;  %v1003_v48 = vmov 2102212464  }
  0x18   :  { %v920_v15 = vld [vmem:[#allocation2 + $0x70] sm:$0xff]   ;;  %v922_v17 = vld [vmem:[#allocation2 + $0x78] sm:$0xff]   ;;  %v788_v19 = vld [vmem:[%s1145_s1] ss:$0 sm:$0xff]  ;;  %v1004_v50 = vmov 920167782   ;;  %p977_p11 = por %p976_p10, %p975_p9 }
  0x19   :  { %43 = vperm.xlu0 %907, %v34_v2   ;;  %v921_v16 = vld [vmem:[#allocation2 + $0x30] sm:$0xff]   ;;  %v923_v18 = vld [vmem:[#allocation2 + $0x38] sm:$0xff]   ;;  %v1005_v57 = vmov 1326507024  }
  0x1a   :  { %836 = vmatpush3.bf16.msra.mxu0 %v911_v6  ;;  %p978_p12 = pnand %p977_p11, %p971_p8 }
  0x1b   :  { %837 = vmatprep.subr.bf16.mxu0 %v912_v7 }
  0x1e   :  { %838 = vmatpush3.bf16.msra.mxu0 %v913_v8 }
  0x1f   :  { %839 = vmatprep.subr.bf16.mxu0 %v914_v9 }
  0x22   :  { %840 = vmatpush3.bf16.msra.mxu0 %v915_v10 }
  0x23   :  { %841 = vmatprep.subr.bf16.mxu0 %v916_v11 }
  0x26   :  { %842 = vmatpush3.bf16.msra.mxu0 %v917_v12 }
  0x27   :  { %843 = vmatprep.subr.bf16.mxu0 %v918_v13 }
  0x2a   :  { %844 = vmatpush3.bf16.msra.mxu0 %v919_v14 }
  0x2b   :  { %845 = vmatprep.subr.bf16.mxu0 %v920_v15 }
  0x2e   :  { %846 = vmatpush3.bf16.msra.mxu0 %v921_v16 }
  0x2f   :  { %847 = vmatprep.subr.bf16.mxu0 %v922_v17 }
  0x32   :  { %848 = vmatpush3.bf16.msra.mxu0 %v923_v18 }
  0x94   :  { %v39_v20 = vpop.permute.xlu0 %38 }
  0x95   :  { %v1057_v21 = vmul.f32 %v788_v19, %v39_v20 }
  0x97   :  { %v54_v22 = vand.u32 2147483647, %v1057_v21  ;;  %v57_v23 = vand.u32 2139095040, %v1057_v21  ;;  %vm56_vm14 = vcmp.lt.s32.totalorder %v1057_v21, 0 }
  0x98   :  { %v44_v24 = vpop.permute.xlu0 %43 }
  0x99   :  { %v58_v25 = vshrl.u32 %v57_v23, 23  ;;  %v1061_v26 = vmul.f32 %v788_v19, %v44_v24  ;;  %v61_v27 = vand.u32 8388607, %v54_v22  ;;  %vm55_vm15 = vcmp.le.f32.partialorder %v54_v22, 0.7853982 }
  0x9b   :  { %v789_v28 = vadd.s32 4294967169, %v58_v25  ;;  %v160_v29 = vand.u32 2139095040, %v1061_v26  ;;  %v62_v31 = vor.u32 8388608, %v61_v27  ;;  %v157_v33 = vand.u32 2147483647, %v1061_v26 }
  0x9d   :  { %v64_v30 = vadd.s32 1, %v789_v28  ;;  %v161_v32 = vshrl.u32 %v160_v29, 23  ;;  %v1067_v38 = vshll.u32 %v62_v31, 8  ;;  %v164_v42 = vand.u32 8388607, %v157_v33 }
  0x9f   :  { %vm65_vm0 = vcmp.gt.s32.totalorder %v64_v30, 0  ;;  %v793_v35 = vadd.s32 4294967169, %v161_v32  ;;  %v165_v8 = vor.u32 8388608, %v164_v42 }
  0xa0   :  { %v66_v34 = vsel %vm65_vm0, %v64_v30, 0  ;;  %vm159_vm0 = vcmp.lt.s32.totalorder %v1061_v26, 0 }
  0xa1   :  { %v67_v36 = vshrl.u32 %v66_v34, 5  ;;  %v68_v37 = vand.u32 31, %v66_v34  ;;  %v167_v43 = vadd.s32 1, %v793_v35  ;;  %v205_v23 = vshll.u32 %v165_v8, 8 }
  0xa3   :  { %v69_v39 = vsub.s32 32, %v68_v37  ;;  %v71_v41 = vshll.u32 %v1000_v40, %v68_v37  ;;  %v74_v45 = vshll.u32 %v1001_v44, %v68_v37  ;;  %v77_v47 = vshll.u32 %v1002_v46, %v68_v37 }
  0xa4   :  { %v80_v49 = vshll.u32 %v1003_v48, %v68_v37  ;;  %v83_v51 = vshll.u32 %v1004_v50, %v68_v37  ;;  %vm86_vm1 = vcmp.lt.s32.totalorder %v67_v36, 1  ;;  %vm88_vm2 = vcmp.lt.s32.totalorder %v67_v36, 3 }
  0xa5   :  { %v72_v52 = vshrl.u32 %v1001_v44, %v69_v39  ;;  %v75_v53 = vshrl.u32 %v1002_v46, %v69_v39  ;;  %v78_v54 = vshrl.u32 %v1003_v48, %v69_v39  ;;  %v70_v55 = vshrl.u32 %v1000_v40, %v69_v39 }
  0xa6   :  { %v81_v56 = vshrl.u32 %v1004_v50, %v69_v39  ;;  %v84_v58 = vshrl.u32 %v1005_v57, %v69_v39  ;;  %vm168_vm3 = vcmp.gt.s32.totalorder %v167_v43, 0  ;;  %vm89_vm4 = vcmp.lt.s32.totalorder %v67_v36, 4 }
  0xa7   :  { %v73_v59 = vor.u32 %v72_v52, %v71_v41  ;;  %v76_v60 = vor.u32 %v75_v53, %v74_v45  ;;  %v79_v61 = vor.u32 %v78_v54, %v77_v47  ;;  %v169_v0 = vsel %vm168_vm3, %v167_v43, 0 }
  0xa8   :  { %v82_v62 = vor.u32 %v81_v56, %v80_v49  ;;  %v85_v63 = vor.u32 %v84_v58, %v83_v51  ;;  %vm87_vm5 = vcmp.lt.s32.totalorder %v67_v36, 2  ;;  %v171_v11 = vand.u32 31, %v169_v0 }
  0xa9   :  { %v90_v1 = vsel %vm86_vm1, %v70_v55, %v73_v59  ;;  %v91_v2 = vsel %vm89_vm4, %v79_v61, 2102212464  ;;  %v94_v3 = vsel %vm86_vm1, %v73_v59, %v76_v60  ;;  %v98_v4 = vsel %vm86_vm1, %v76_v60, %v79_v61 }
  0xaa   :  { %v92_v5 = vsel %vm88_vm2, %v76_v60, %v91_v2  ;;  %v95_v6 = vsel %vm89_vm4, %v82_v62, 920167782  ;;  %v99_v7 = vsel %vm89_vm4, %v85_v63, 1326507024  ;;  %v170_v19 = vshrl.u32 %v169_v0, 5 }
  0xab   :  { %v96_v9 = vsel %vm88_vm2, %v79_v61, %v95_v6  ;;  %v100_v10 = vsel %vm88_vm2, %v82_v62, %v99_v7  ;;  %v93_v12 = vsel %vm87_vm5, %v90_v1, %v92_v5  ;;  %v172_v20 = vsub.s32 32, %v171_v11 }
  0xac   :  { %v97_v13 = vsel %vm87_vm5, %v94_v3, %v96_v9  ;;  %v101_v14 = vsel %vm87_vm5, %v98_v4, %v100_v10  ;;  %v109_v24 = vmul.u32 %v1067_v38, %v93_v12  ;;  %v174_v25 = vshll.u32 %v1000_v40, %v171_v11 }
  0xad   :  { %v1080_v15 = vmul.u32.u64.low %v1067_v38, %v101_v14  ;;  %v1081_v16 = vmul.u32.u64.high %v1067_v38, %v101_v14, %v1080_v15  ;;  %v1084_v17 = vmul.u32.u64.low %v1067_v38, %v97_v13  ;;  %v1085_v18 = vmul.u32.u64.high %v1067_v38, %v97_v13, %v1084_v17 }
  0xae   :  { %v177_v27 = vshll.u32 %v1001_v44, %v171_v11  ;;  %v180_v28 = vshll.u32 %v1002_v46, %v171_v11  ;;  %v175_v29 = vshrl.u32 %v1001_v44, %v172_v20  ;;  %v178_v30 = vshrl.u32 %v1002_v46, %v172_v20 }
  0xaf   :  { %v181_v31 = vshrl.u32 %v1003_v48, %v172_v20  ;;  %v183_v32 = vshll.u32 %v1003_v48, %v171_v11  ;;  %vm111_vm6 = vc.u32 %v1081_v16, %v1084_v17  ;;  %v112_v34 = vadd.s32 1, %v1085_v18 }
  0xb0   :  { %v184_v35 = vshrl.u32 %v1004_v50, %v172_v20  ;;  %v186_v36 = vshll.u32 %v1004_v50, %v171_v11  ;;  %v176_v37 = vor.u32 %v175_v29, %v174_v25  ;;  %v179_v39 = vor.u32 %v178_v30, %v177_v27 }
  0xb1   :  { %v182_v41 = vor.u32 %v181_v31, %v180_v28  ;;  %v187_v42 = vshrl.u32 %v1005_v57, %v172_v20  ;;  %v113_v38 = vsel %vm111_vm6, %v112_v34, %v1085_v18  ;;  %vm189_vm7 = vcmp.lt.s32.totalorder %v170_v19, 1 }
  0xb2   :  { %v185_v43 = vor.u32 %v184_v35, %v183_v32  ;;  %vm192_vm8 = vcmp.lt.s32.totalorder %v170_v19, 4  ;;  %v114_v44 = vadd.s32 %v113_v38, %v109_v24  ;;  %vm191_vm9 = vcmp.lt.s32.totalorder %v170_v19, 3 }
  0xb3   :  { %v188_v45 = vor.u32 %v187_v42, %v186_v36  ;;  %v194_v46 = vsel %vm192_vm8, %v182_v41, 2102212464  ;;  %v173_v47 = vshrl.u32 %v1000_v40, %v172_v20  ;;  %v197_v48 = vsel %vm189_vm7, %v176_v37, %v179_v39 }
  0xb4   :  { %v198_v49 = vsel %vm192_vm8, %v185_v43, 920167782  ;;  %v201_v51 = vsel %vm189_vm7, %v179_v39, %v182_v41  ;;  %v115_v52 = vadd.s32 536870912, %v114_v44  ;;  %vm190_vm10 = vcmp.lt.s32.totalorder %v170_v19, 2 }
  0xb5   :  { %v199_v50 = vsel %vm191_vm9, %v182_v41, %v198_v49  ;;  %v202_v53 = vsel %vm192_vm8, %v188_v45, 1326507024  ;;  %v193_v54 = vsel %vm189_vm7, %v173_v47, %v176_v37  ;;  %v195_v55 = vsel %vm191_vm9, %v179_v39, %v194_v46 }
  0xb6   :  { %v200_v56 = vsel %vm190_vm10, %v197_v48, %v199_v50  ;;  %v203_v57 = vsel %vm191_vm9, %v185_v43, %v202_v53  ;;  %v1095_v58 = vshrl.u32 %v115_v52, 30  ;;  %v196_v0 = vsel %vm190_vm10, %v193_v54, %v195_v55 }
  0xb7   :  { %v204_v59 = vsel %vm190_vm10, %v201_v51, %v203_v57  ;;  %v1097_v60 = vmul.u32.u64.low %v205_v23, %v200_v56  ;;  %v1098_v61 = vmul.u32.u64.high %v205_v23, %v200_v56, %v1097_v60  ;;  %v212_v3 = vmul.u32 %v205_v23, %v196_v0 }
  0xb8   :  { %v1100_v62 = vmul.u32.u64.low %v205_v23, %v204_v59  ;;  %v1101_v63 = vmul.u32.u64.high %v205_v23, %v204_v59, %v1100_v62  ;;  %v117_v40 = vshll.u32 %v1095_v58, 30  ;;  %v110_v15 = vadd.s32 %v1084_v17, %v1081_v16 }
  0xb9   :  { %v215_v2 = vadd.s32 1, %v1098_v61  ;;  %v140_v49 = vsub.s32 4, %v1095_v58  ;;  %vm158_vm1 = vcmp.le.f32.partialorder %v157_v33, 0.7853982 }
  0xba   :  { %v118_v1 = vsub.s32 %v114_v44, %v117_v40  ;;  %vm214_vm11 = vc.u32 %v1101_v63, %v1097_v60  ;;  %v213_v39 = vadd.s32 %v1097_v60, %v1101_v63 }
  0xbb   :  { %v216_v5 = vsel %vm214_vm11, %v215_v2, %v1098_v61  ;;  %v141_v54 = vsel %vm56_vm14, %v140_v49, %v1095_v58 }
  0xbc   :  { %v120_v4 = vsub.s32 0, %v118_v1  ;;  %v217_v6 = vadd.s32 %v216_v5, %v212_v3  ;;  %v143_v22 = vsel %vm55_vm15, 0, %v141_v54 }
  0xbd   :  { %v353_v61 = vadd.s32 3, %v143_v22  ;;  %v147_v0 = vand.u32 3, %v143_v22 }
  0xbe   :  { %v790_v7 = vmin.u32 %v120_v4, %v118_v1  ;;  %v218_v8 = vadd.s32 536870912, %v217_v6 }
  0xbf   :  { %v354_v58 = vand.u32 3, %v353_v61  ;;  %vm149_vm2 = vcmp.eq.s32.totalorder %v147_v0, 0  ;;  %vm152_vm3 = vcmp.eq.s32.totalorder %v147_v0, 2  ;;  %vm148_vm6 = vcmp.lt.s32.totalorder %v147_v0, 2 }
  0xc0   :  { %v122_v9 = vclz %v790_v7  ;;  %v219_v10 = vshrl.u32 %v218_v8, 30 }
  0xc1   :  { %vm356_vm4 = vcmp.eq.s32.totalorder %v354_v58, 0  ;;  %vm359_vm5 = vcmp.eq.s32.totalorder %v354_v58, 2  ;;  %vm355_vm8 = vcmp.lt.s32.totalorder %v354_v58, 2 }
  0xc2   :  { %v791_v11 = vadd.s32 4294967294, %v122_v9  ;;  %v220_v12 = vshll.u32 %v219_v10, 30  ;;  %v243_v53 = vsub.s32 4, %v219_v10 }
  0xc4   :  { %vm792_vm12 = vcmp.lt.s32.totalorder %v791_v11, 0  ;;  %v221_v14 = vsub.s32 %v217_v6, %v220_v12  ;;  %v244_v57 = vsel %vm159_vm0, %v243_v53, %v219_v10 }
  0xc5   :  { %v125_v13 = vsel %vm792_vm12, 0, %v791_v11  ;;  %v246_v60 = vsel %vm158_vm1, 0, %v244_v57  ;;  %v824_v57 = vld [vmem:[%s1147_s3 + $0x1] ss:$0 sm:$0xff] }
  0xc6   :  { %v126_v18 = vsub.s32 32, %v125_v13  ;;  %v130_v19 = vsub.s32 4294967266, %v125_v13  ;;  %v223_v20 = vsub.s32 0, %v221_v14  ;;  %v127_v23 = vshll.u32 %v118_v1, %v125_v13 }
  0xc7   :  { %v457_v40 = vadd.s32 3, %v246_v60  ;;  %v250_v3 = vand.u32 3, %v246_v60 }
  0xc8   :  { %v128_v24 = vshrl.u32 %v110_v15, %v126_v18  ;;  %v131_v25 = vadd.s32 127, %v130_v19  ;;  %v794_v27 = vmin.u32 %v223_v20, %v221_v14 }
  0xc9   :  { %v458_v4 = vand.u32 3, %v457_v40  ;;  %vm252_vm7 = vcmp.eq.s32.totalorder %v250_v3, 0  ;;  %vm255_vm9 = vcmp.eq.s32.totalorder %v250_v3, 2  ;;  %vm251_vm12 = vcmp.lt.s32.totalorder %v250_v3, 2 }
  0xca   :  { %v129_v28 = vor.u32 %v128_v24, %v127_v23  ;;  %v132_v29 = vshll.u32 %v131_v25, 23  ;;  %v225_v30 = vclz %v794_v27 }
  0xcb   :  { %vm460_vm10 = vcmp.eq.s32.totalorder %v458_v4, 0  ;;  %vm463_vm11 = vcmp.eq.s32.totalorder %v458_v4, 2 }
  0xcc   :  { %v133_v31 = vor.u32 4788187, %v132_v29  ;;  %v795_v32 = vadd.s32 4294967294, %v225_v30  ;;  %v136_v35 = vcvt.s32.f32 %v129_v28 }
  0xce   :  { %v134_v34 = vand.u32 2147483647, %v133_v31  ;;  %vm796_vm13 = vcmp.lt.s32.totalorder %v795_v32, 0  ;;  %v924_v31 = vld [vmem:[#allocation2 + $0x80] sm:$0xff]  }
  0xcf   :  { %v228_v37 = vsel %vm796_vm13, 0, %v795_v32  ;;  %vm459_vm13 = vcmp.lt.s32.totalorder %v458_v4, 2  ;;  %v1006_v32 = vmov 0.0  }
  0xd0   :  { %v137_v36 = vmul.f32 %v136_v35, %v134_v34  ;;  %v229_v16 = vsub.s32 32, %v228_v37  ;;  %v233_v17 = vsub.s32 4294967266, %v228_v37  ;;  %v230_v42 = vshll.u32 %v221_v14, %v228_v37  ;;  %864 = vmatprep.subr.bf16.mxu1 %v1006_v32  ;;  %v925_v34 = vld [vmem:[#allocation2 + $0x88] sm:$0xff]   ;;  %v928_v35 = vld [vmem:[#allocation2 + $0xa0] sm:$0xff]   ;;  %v930_v37 = vld [vmem:[#allocation2 + $0xb0] sm:$0xff]  }
  0xd1   :  { %865 = vmatpush3.bf16.msra.mxu1 %v924_v31 }
  0xd2   :  { %v138_v41 = vxor.u32 2147483648, %v137_v36  ;;  %v231_v38 = vshrl.u32 %v213_v39, %v229_v16  ;;  %v234_v43 = vadd.s32 127, %v233_v17  ;;  %866 = vmatprep.subr.bf16.mxu1 %v1006_v32  ;;  %v931_v39 = vld [vmem:[#allocation2 + $0xb8] sm:$0xff]   ;;  %v805_v17 = vld [vmem:[%s1147_s3] ss:$0 sm:$0xff] }
  0xd4   :  { %v139_v44 = vsel %vm56_vm14, %v138_v41, %v137_v36  ;;  %v232_v45 = vor.u32 %v231_v38, %v230_v42  ;;  %v235_v46 = vshll.u32 %v234_v43, 23  ;;  %vm146_vm14 = vweird.f32 %v1057_v21  ;;  %v929_v36 = vld [vmem:[#allocation2 + $0xa8] sm:$0xff]  }
  0xd5   :  { %v142_v47 = vsel %vm55_vm15, %v1057_v21, %v139_v44  ;;  %vm249_vm15 = vweird.f32 %v1061_v26  ;;  %867 = vmatpush3.bf16.msra.mxu1 %v925_v34  ;;  %v926_v21 = vld [vmem:[#allocation2 + $0x90] sm:$0xff]  }
  0xd6   :  { %v236_v48 = vor.u32 4788187, %v235_v46  ;;  %v239_v52 = vcvt.s32.f32 %v232_v45  ;;  %932 = vcosq.f32 %v142_v47  ;;  %868 = vmatprep.subr.bf16.mxu1 %v1006_v32 }
  0xd7   :  { %934 = vsinq.f32 %v142_v47 }
  0xd8   :  { %v237_v51 = vand.u32 2147483647, %v236_v48 }
  0xd9   :  { %869 = vmatpush3.bf16.msra.mxu1 %v926_v21 }
  0xda   :  { %v240_v50 = vmul.f32 %v239_v52, %v237_v51  ;;  %870 = vmatprep.subr.bf16.mxu1 %v1006_v32 }
  0xdc   :  { %v241_v55 = vxor.u32 2147483648, %v240_v50 }
  0xde   :  { %v242_v56 = vsel %vm159_vm0, %v241_v55, %v240_v50  ;;  %vm1007_vm0 = vmmov 0  }
  0xdf   :  { %v245_v59 = vsel %vm158_vm1, %v1061_v26, %v242_v56  ;;  %v927_v26 = vld [vmem:[#allocation2 + $0x98] sm:$0xff]   ;;  %880 = vmatprep.mubr.msk.bf16.mxu1 %vm1007_vm0, %v1006_v32 }
  0xe0   :  { %936 = vcosq.f32 %v245_v59  ;;  %v933_v62 = vpop.eup %932  ;;  %871 = vmatpush3.bf16.msra.mxu1 %v927_v26 }
  0xe1   :  { %938 = vsinq.f32 %v245_v59  ;;  %v935_v63 = vpop.eup %934  ;;  %v153_v2 = vxor.u32 2147483648, %v933_v62  ;;  %872 = vmatprep.subr.bf16.mxu1 %v1006_v32 }
  0xe2   :  { %v150_v1 = vxor.u32 2147483648, %v935_v63 }
  0xe3   :  { %v154_v6 = vsel %vm152_vm3, %v153_v2, %v935_v63  ;;  %v361_v8 = vsel %vm359_vm5, %v153_v2, %v935_v63 }
  0xe4   :  { %v151_v5 = vsel %vm149_vm2, %v933_v62, %v150_v1  ;;  %v358_v7 = vsel %vm356_vm4, %v933_v62, %v150_v1  ;;  %873 = vmatpush3.bf16.msra.mxu1 %v928_v35 }
  0xe5   :  { %v155_v12 = vsel %vm148_vm6, %v151_v5, %v154_v6  ;;  %v362_v14 = vsel %vm355_vm8, %v358_v7, %v361_v8  ;;  %874 = vmatprep.subr.bf16.mxu1 %v1006_v32 }
  0xe6   :  { %v156_v24 = vsel %vm146_vm14, nan, %v155_v12  ;;  %v363_v27 = vsel %vm146_vm14, nan, %v362_v14 }
  0xe8   :  { %875 = vmatpush3.bf16.msra.mxu1 %v929_v36 }
  0xe9   :  { %876 = vmatprep.subr.bf16.mxu1 %v1006_v32 }
  0xea   :  { %v937_v33 = vpop.eup %936 }
  0xeb   :  { %v939_v9 = vpop.eup %938  ;;  %v256_v10 = vxor.u32 2147483648, %v937_v33 }
  0xec   :  { %v253_v11 = vxor.u32 2147483648, %v939_v9  ;;  %877 = vmatpush3.bf16.msra.mxu1 %v930_v37 }
  0xed   :  { %v257_v13 = vsel %vm255_vm9, %v256_v10, %v939_v9  ;;  %v465_v15 = vsel %vm463_vm11, %v256_v10, %v939_v9  ;;  %878 = vmatprep.subr.bf16.mxu1 %v1006_v32 }
  0xee   :  { %v254_v18 = vsel %vm252_vm7, %v937_v33, %v253_v11  ;;  %v462_v19 = vsel %vm460_vm10, %v937_v33, %v253_v11 }
  0xef   :  { %v258_v20 = vsel %vm251_vm12, %v254_v18, %v257_v13  ;;  %v466_v23 = vsel %vm459_vm13, %v462_v19, %v465_v15 }
  0xf0   :  { %v259_v25 = vsel %vm249_vm15, nan, %v258_v20  ;;  %v467_v28 = vsel %vm249_vm15, nan, %v466_v23  ;;  %879 = vmatpush3.bf16.msra.mxu1 %v931_v39 }
  0xf1   :  { %v469_v29 = vpack.c.bf16 %v467_v28, %v363_v27  ;;  %v468_v30 = vpack.c.bf16 %v259_v25, %v156_v24 }
  0xf3   :  { %635 = vmatprep.mubr.bf16.mxu0 %v469_v29 }
  0xf4   :  { %636 = vmatmul.mubr.bf16.vlgmr.msra.gmra.mrb[0].mxu0 %v468_v30 }
 0x1c7   :  { %v849_v16 = vpop.f32.mrb[0].mxu0 }
 0x1c8   :  { %v850_v41 = vpop.f32.mrb[1].mxu0 }
 0x1c9   :  { %v851_v42 = vadd.f32 %v850_v41, %v849_v16  ;;  %v852_v38 = vpop.f32.mrb[2].mxu0 }
 0x1ca   :  { %v853_v43 = vpop.f32.mrb[3].mxu0 }
 0x1cb   :  { %v638_v44 = vadd.f32 %v851_v42, %v805_v17  ;;  %v854_v45 = vadd.f32 %v853_v43, %v852_v38 }
 0x1cd   :  { %v822_v46 = vmul.f32 -1.442695, %v638_v44  ;;  %v641_v47 = vadd.f32 %v854_v45, %v805_v17 }
 0x1cf   :  { %940 = vpow2.f32 %v822_v46  ;;  %v823_v48 = vmul.f32 -1.442695, %v641_v47 }
 0x1d1   :  { %942 = vpow2.f32 %v823_v48 }
 0x1d9   :  { %v941_v49 = vpop.eup %940 }
 0x1da   :  { %v650_v51 = vadd.f32 1.0, %v941_v49 }
 0x1db   :  { %v943_v52 = vpop.eup %942 }
 0x1dc   :  { %944 = vrcp.f32 %v650_v51  ;;  %v651_v50 = vadd.f32 1.0, %v943_v52 }
 0x1de   :  { %946 = vrcp.f32 %v651_v50 }
 0x1e6   :  { %v945_v53 = vpop.eup %944 }
 0x1e7   :  { %v656_v55 = vmul.f32 %v945_v53, %v638_v44 }
 0x1e8   :  { %v947_v54 = vpop.eup %946 }
 0x1e9   :  { %v657_v56 = vmul.f32 %v947_v54, %v641_v47 }
 0x1eb   :  { %v674_v22 = vpack.c.bf16 %v657_v56, %v656_v55 }
 0x1ed   :  { %881 = vmatmul.mubr.bf16.vlgmr.msra.gmra.mrb[0].mxu1 %v674_v22 }
 0x2c0   :  { %v762_v59 = vpop.f32.mrb[0].mxu1 }
 0x2c1   :  { %v763_v60 = vadd.f32 %v824_v57, %v762_v59  ;;  %v882_v61 = vpop.f32.mrb[1].mxu1 }
 0x2c2   :  { %v765_v62 = vpop.f32.mrb[2].mxu1 }
 0x2c3   :  { %769 = vst [vmem:[#allocation5] sm:$0xff] %v763_v60  ;;  %v766_v63 = vadd.f32 %v824_v57, %v765_v62  ;;  %v883_v40 = vpop.f32.mrb[3].mxu1 }
 0x2c5   :  { %770 = vst [vmem:[#allocation5 + $0x8] sm:$0xff] %v766_v63 }
 0x2c6   :  { %981 = shalt.err (!%p978_p12)
}
 0x2c7   :  { %s982_s14 = scalar_lea.hbm %s1148_s4, 256 }
 0x2c8   :  { %p983_p13 = scmp.ne.s32.totalorder %s1148_s4, %s982_s14  ;;  %p986_p0 = scmp.lt.u32.totalorder %s982_s14, %s1148_s4 }
 0x2ca   :  { %p988_p1 = pnand %p986_p0, %p983_p13 }
 0x2cc   :  { %991 = shalt.err (!%p988_p1)
}
 0x2cd   :  { %s1009_s19 = smov 128   ;;  %s1010_s20 = smov 8  }
 0x2ce   :  { %782 = dma.vmem_to_hbm [thread:$0]  %s777_s11, 256, %s1148_s4, [#allocation4], %s1009_s19, %s1009_s19, %s1010_s20  }
 0x2cf   :  { %994 = dma.done.wait [#allocation4], 256  }
 0x2d0   :  { %995 = vsyncadd [#allocation4], 4294967040 }
 0x2d1   :  { %786 = vsyncpa [#allocation3], 1 }
 0x2d2   :  { %787 = vsyncpa [#allocation4], 1 }

</bundles_post_ra>
